<compile_context>
chip_gen: v5e
topology: v5e:2x2
jax: 0.10.0
libtpu: 0.0.40
codegen_flags: <defaults>
</compile_context>

<pallas_src>
import functools

import numpy as np

import jax
import jax.numpy as jnp
from jax.experimental import pallas as pl
from jax.experimental.pallas import tpu as pltpu


# ---------------------------------------------------------------------------
# helpers
# ---------------------------------------------------------------------------
def _round_up(x, m):
    return (x + m - 1) // m * m


def _pad2(a, b):
    """Element count of a (sublane, lane) tile padded to (8, 128)."""
    return _round_up(max(int(a), 1), 8) * _round_up(max(int(b), 1), 128)


def _vmem_capacity_bytes():
    try:
        return int(pltpu.get_tpu_info().vmem_capacity_bytes)
    except Exception:
        return 64 * 1024 * 1024            # conservative (v7x-sized) fallback


def _pick_ct(c, c_offset, per_channel_bytes, budget_bytes, n_batch, cap=256):
    """Channel tile: largest divisor of `c` (and of the output channel offset,
    so the offset is a whole number of blocks) that fits the VMEM budget and
    keeps >= 2 "parallel" grid steps for the v7x dual TensorCore."""
    cands = [t for t in range(min(c, cap), 0, -1)
             if c % t == 0 and c_offset % t == 0]
    fitting = [t for t in cands if t * per_channel_bytes <= budget_bytes]
    if not fitting:
        fitting = [cands[-1]]              # ct = 1 always divides
    ct = fitting[0]
    if n_batch * (c // ct) < 2:            # keep both v7x cores busy
        for t in fitting:
            if n_batch * (c // t) >= 2:
                ct = t
                break
    # TODO(synk): prime channel counts degrade to ct=1 (many tiny grid steps);
    # padding the channel dim would avoid that perf cliff.
    return ct


# ---------------------------------------------------------------------------
# Kernel A: adaptive_max_pool2d(l) + adaptive_avg_pool2d(l) -> channels [0, Cl)
# of the shared output buffer.  One contiguous (ct, Hl, Wl) block per step.
# ---------------------------------------------------------------------------
def _pool_kernel(l_ref, sel_ref, win_ref, o_ref, *, r_h, r_w, hm, wm, inv):
    ct = l_ref.shape[0]
    wl = l_ref.shape[-1]

    # --- H-window reduce: sublane-strided loads + VPU max / f32 add ---------
    if r_h > 1:
        acc_mx = l_ref[:, pl.ds(0, hm, stride=r_h), :]
    else:
        acc_mx = l_ref[...]
    acc_sm = acc_mx.astype(jnp.float32)
    for dh in range(1, r_h):
        xd = l_ref[:, pl.ds(dh, hm, stride=r_h), :]
        acc_mx = jnp.maximum(acc_mx, xd)
        acc_sm = acc_sm + xd.astype(jnp.float32)

    # --- W-window reduce: 2 small one-hot matmuls ---------------------------
    hmax2 = acc_mx.reshape(ct * hm, wl)            # max path: input dtype
    hsum2 = acc_sm.reshape(ct * hm, wl)            # sum path: f32 end-to-end
    # selection matmul: column dw*wm + j  <-  hmax2[:, j*r_w + dw]
    pmax = jnp.dot(hmax2, sel_ref[...], preferred_element_type=jnp.float32)
    # window-membership matmul: column j  <-  sum_dw hsum2[:, j*r_w + dw]
    psum = jnp.dot(hsum2, win_ref[...], preferred_element_type=jnp.float32)
    mx = pmax[:, 0:wm]
    for dw in range(1, r_w):
        mx = jnp.maximum(mx, pmax[:, dw * wm:(dw + 1) * wm])

    out = mx + psum * inv                          # max pool + avg pool
    o_ref[...] = out.reshape(ct, hm, wm).astype(o_ref.dtype)


def _pool_into(l, out_struct, hm, wm, vmem_limit, block_budget):
    n, cl, hl, wl = l.shape
    r_h, r_w = hl // hm, wl // wm
    in_it = np.dtype(l.dtype).itemsize
    out_it = np.dtype(out_struct.dtype).itemsize
    per_c = (2 * _pad2(hl, wl) * in_it             # double-buffered input block
             + 2 * _pad2(hm, wm) * out_it          # double-buffered output block
             + 3 * _pad2(hm, wl) * 4)              # f32 in-kernel intermediates
    ct = _pick_ct(cl, 0, per_c, block_budget, n)

    # one-hot matrices, built once on the host (not rebuilt per grid step)
    sel = np.zeros((wl, r_w * wm), dtype=np.float32)
    win = np.zeros((wl, wm), dtype=np.float32)
    for j in range(wm):
        for dw in range(r_w):
            sel[j * r_w + dw, dw * wm + j] = 1.0
            win[j * r_w + dw, j] = 1.0
    sel = jnp.asarray(sel, dtype=l.dtype)          # max path in input dtype
    win = jnp.asarray(win, dtype=jnp.float32)      # sum path in f32

    kernel = functools.partial(_pool_kernel, r_h=r_h, r_w=r_w, hm=hm, wm=wm,
                               inv=1.0 / float(r_h * r_w))
    return pl.pallas_call(
        kernel,
        out_shape=out_struct,
        grid=(n, cl // ct),
        in_specs=[pl.BlockSpec((None, ct, hl, wl), lambda b, c: (b, c, 0, 0)),
                  pl.BlockSpec((wl, r_w * wm), lambda b, c: (0, 0)),
                  pl.BlockSpec((wl, wm), lambda b, c: (0, 0))],
        out_specs=pl.BlockSpec((None, ct, hm, wm), lambda b, c: (b, c, 0, 0)),
        compiler_params=pltpu.CompilerParams(
            dimension_semantics=("parallel", "parallel"),
            vmem_limit_bytes=vmem_limit),
    )(l, sel, win)


# ---------------------------------------------------------------------------
# Kernel B: copy m into channels [Cl, Cl+Cm) of the shared buffer (aliased).
# ---------------------------------------------------------------------------
def _copy_kernel(m_ref, prev_ref, o_ref):
    del prev_ref                                    # aliased output, never read
    o_ref[...] = m_ref[...].astype(o_ref.dtype)


def _copy_into(m, buf, c_off, vmem_limit, block_budget):
    n, cm, hm, wm = m.shape
    per_c = 2 * _pad2(hm, wm) * (np.dtype(m.dtype).itemsize
                                 + np.dtype(buf.dtype).itemsize)
    ct = _pick_ct(cm, c_off, per_c, block_budget, n)
    off = c_off // ct
    return pl.pallas_call(
        _copy_kernel,
        out_shape=jax.ShapeDtypeStruct(buf.shape, buf.dtype),
        grid=(n, cm // ct),
        in_specs=[pl.BlockSpec((None, ct, hm, wm), lambda b, c: (b, c, 0, 0)),
                  pl.BlockSpec(memory_space=pl.ANY)],
        out_specs=pl.BlockSpec((None, ct, hm, wm),
                               lambda b, c: (b, off + c, 0, 0)),
        input_output_aliases={1: 0},
        compiler_params=pltpu.CompilerParams(
            dimension_semantics=("parallel", "parallel"),
            vmem_limit_bytes=vmem_limit),
    )(m, buf)


# ---------------------------------------------------------------------------
# Kernel C: nearest-neighbour upsample of s into channels [Cl+Cm, Ctot) (aliased).
# ---------------------------------------------------------------------------
def _upsample_kernel(s_ref, repw_ref, prev_ref, o_ref, *, h_runs, wm):
    del prev_ref                                    # aliased output, never read
    ct, hs, ws = s_ref.shape
    # nearest along W: one one-hot replication matmul (exact selection)
    upw = jnp.dot(s_ref[...].reshape(ct * hs, ws), repw_ref[...],
                  preferred_element_type=jnp.float32)
    upw = upw.reshape(ct, hs, wm).astype(o_ref.dtype)
    # nearest along H: pure data movement — broadcast each source row over its
    # contiguous run of output rows and store (no batched einsum / MXU work).
    for (j, start, length) in h_runs:
        row = upw[:, j:j + 1, :]
        o_ref[:, start:start + length, :] = jnp.broadcast_to(
            row, (ct, length, wm))


def _upsample_into(s, buf, c_off, hm, wm, vmem_limit, block_budget):
    n, cs, hs, ws = s.shape
    per_c = (2 * _pad2(hs, ws) * np.dtype(s.dtype).itemsize
             + 2 * _pad2(hm, wm) * np.dtype(buf.dtype).itemsize
             + 2 * _pad2(hm, wm) * 4)
    ct = _pick_ct(cs, c_off, per_c, block_budget, n)
    off = c_off // ct

    # nearest-neighbour source column for every output column
    repw = np.zeros((ws, wm), dtype=np.float32)
    for j in range(wm):
        repw[(j * ws) // wm, j] = 1.0
    repw = jnp.asarray(repw, dtype=s.dtype)

    # contiguous run of output rows for every source row
    src = [(i * hs) // hm for i in range(hm)]
    h_runs = []
    for j in range(hs):
        rows = [i for i in range(hm) if src[i] == j]
        if rows:
            h_runs.append((j, rows[0], len(rows)))

    kernel = functools.partial(_upsample_kernel, h_runs=tuple(h_runs), wm=wm)
    return pl.pallas_call(
        kernel,
        out_shape=jax.ShapeDtypeStruct(buf.shape, buf.dtype),
        grid=(n, cs // ct),
        in_specs=[pl.BlockSpec((None, ct, hs, ws), lambda b, c: (b, c, 0, 0)),
                  pl.BlockSpec((ws, wm), lambda b, c: (0, 0)),
                  pl.BlockSpec(memory_space=pl.ANY)],
        out_specs=pl.BlockSpec((None, ct, hm, wm),
                               lambda b, c: (b, off + c, 0, 0)),
        input_output_aliases={2: 0},
        compiler_params=pltpu.CompilerParams(
            dimension_semantics=("parallel", "parallel"),
            vmem_limit_bytes=vmem_limit),
    )(s, repw, buf)


# ---------------------------------------------------------------------------
# Zoom_cat forward
# ---------------------------------------------------------------------------
@jax.jit
def zoom_cat(l, m, s):
    """ASF-YOLO Zoom_cat: [maxpool(l)+avgpool(l), m, nearest_up(s)] along C."""
    n, cl, hl, wl = l.shape
    nm, cm, hm, wm = m.shape
    ns, cs, hs, ws = s.shape
    assert n == nm == ns
    # Exact adaptive pooling implemented for the evenly-divisible case.
    assert hl % hm == 0 and wl % wm == 0
    # TODO(synk): general non-divisible adaptive-pool bin boundaries not implemented.

    out_dtype = jnp.result_type(l.dtype, m.dtype, s.dtype)
    c_total = cl + cm + cs
    out_struct = jax.ShapeDtypeStruct((n, c_total, hm, wm), out_dtype)

    cap = _vmem_capacity_bytes()                   # 128 MiB v5e/v6e, 64 MiB v7x
    vmem_limit = int(min(cap // 2, 100 * 1024 * 1024))
    block_budget = cap // 5                        # padded-block budget w/ headroom

    # 1) l: adaptive max+avg pool  -> channels [0, cl)        (allocates buffer)
    buf = _pool_into(l, out_struct, hm, wm, vmem_limit, block_budget)
    # 2) m: passthrough            -> channels [cl, cl+cm)    (in-place, aliased)
    buf = _copy_into(m, buf, cl, vmem_limit, block_budget)
    # 3) s: nearest upsample       -> channels [cl+cm, ctot)  (in-place, aliased)
    buf = _upsample_into(s, buf, cl + cm, hm, wm, vmem_limit, block_budget)
    return buf


if __name__ == "__main__":
    key = jax.random.PRNGKey(0)
    kl, km, ks = jax.random.split(key, 3)

    N, C, H, W = 2, 4, 16, 16
    l = jax.random.normal(kl, (N, C, 2 * H, 2 * W), jnp.float32)     # large
    m = jax.random.normal(km, (N, C, H, W), jnp.float32)             # medium (target)
    s = jax.random.normal(ks, (N, C, H // 2, W // 2), jnp.float32)   # small

    out = jax.block_until_ready(zoom_cat(l, m, s))

    # Pure-JAX reference (divisible case).
    l_r = l.reshape(N, C, H, 2, W, 2)
    l_pool_ref = l_r.max(axis=(3, 5)) + l_r.mean(axis=(3, 5))
    s_up_ref = jnp.repeat(jnp.repeat(s, 2, axis=2), 2, axis=3)
    ref = jnp.concatenate([l_pool_ref, m, s_up_ref], axis=1)

    assert out.shape == ref.shape and out.dtype == ref.dtype
    err = float(jnp.max(jnp.abs(out - ref)))
    assert err < 1e-4, f"max abs err {err}"
    print("KERNEL_OK")
</pallas_src>

<mosaic_0001>
module attributes {stable_mosaic.version = 11 : i64} {
  func.func @_copy_kernel(%arg0: i32, %arg1: i32, %arg2: memref<1x4x16x16xf32, #tpu.memory_space<vmem>>, %arg3: memref<2x12x16x16xf32, #tpu.memory_space<any>>, %arg4: memref<1x4x16x16xf32, #tpu.memory_space<vmem>>) attributes {dimension_semantics = [#tpu.dimension_semantics<parallel>, #tpu.dimension_semantics<parallel>], iteration_bounds = array<i64: 2, 1>, scalar_prefetch = 0 : i64, scratch_operands = 0 : i64, tpu.core_type = #tpu.core_type<tc>, window_params = [{transform_indices = @transform_0, window_bounds = array<i64: 1, 4, 16, 16>}, {}, {transform_indices = @transform_2, window_bounds = array<i64: 1, 4, 16, 16>}]} {
    %c0 = arith.constant 0 : index
    %c0_0 = arith.constant 0 : index
    %c0_1 = arith.constant 0 : index
    %c0_2 = arith.constant 0 : index
    %0 = vector.load %arg2[%c0, %c0_0, %c0_1, %c0_2] : memref<1x4x16x16xf32, #tpu.memory_space<vmem>>, vector<1x4x16x16xf32>
    %1 = vector.shape_cast %0 : vector<1x4x16x16xf32> to vector<4x16x16xf32>
    %c0_3 = arith.constant 0 : index
    %c0_4 = arith.constant 0 : index
    %c0_5 = arith.constant 0 : index
    %c0_6 = arith.constant 0 : index
    %2 = vector.load %arg4[%c0_3, %c0_4, %c0_5, %c0_6] : memref<1x4x16x16xf32, #tpu.memory_space<vmem>>, vector<1x4x16x16xf32>
    %3 = vector.shape_cast %2 : vector<1x4x16x16xf32> to vector<4x16x16xf32>
    %4 = vector.shape_cast %1 : vector<4x16x16xf32> to vector<1x4x16x16xf32>
    tpu.vector_store %arg4[%c0_3, %c0_4, %c0_5, %c0_6], %4 {strides = array<i32>} : memref<1x4x16x16xf32, #tpu.memory_space<vmem>>, vector<1x4x16x16xf32>,
    return
  }
  func.func @transform_0(%arg0: i32, %arg1: i32) -> (i32, i32, i32, i32) {
    %c0_i32 = arith.constant 0 : i32
    %c0_i32_0 = arith.constant 0 : i32
    %c0_i32_1 = arith.constant 0 : i32
    return %arg0, %arg1, %c0_i32, %c0_i32_0 : i32, i32, i32, i32
  }
  func.func @transform_2(%arg0: i32, %arg1: i32) -> (i32, i32, i32, i32) {
    %c1_i32 = arith.constant 1 : i32
    %0 = arith.addi %c1_i32, %arg1 : i32
    %c0_i32 = arith.constant 0 : i32
    %c0_i32_0 = arith.constant 0 : i32
    %c0_i32_1 = arith.constant 0 : i32
    return %arg0, %0, %c0_i32, %c0_i32_0 : i32, i32, i32, i32
  }
}

module attributes {stable_mosaic.version = 11 : i64} {
  func.func @_pool_kernel(%arg0: i32, %arg1: i32, %arg2: memref<1x4x32x32xf32, #tpu.memory_space<vmem>>, %arg3: memref<32x32xf32, #tpu.memory_space<vmem>>, %arg4: memref<32x16xf32, #tpu.memory_space<vmem>>, %arg5: memref<1x4x16x16xf32, #tpu.memory_space<vmem>>) attributes {dimension_semantics = [#tpu.dimension_semantics<parallel>, #tpu.dimension_semantics<parallel>], iteration_bounds = array<i64: 2, 1>, scalar_prefetch = 0 : i64, scratch_operands = 0 : i64, tpu.core_type = #tpu.core_type<tc>, window_params = [{transform_indices = @transform_0, window_bounds = array<i64: 1, 4, 32, 32>}, {pipeline_mode = #tpu.pipeline_mode<synchronous>, transform_indices = @transform_1, window_bounds = array<i64: 32, 32>}, {pipeline_mode = #tpu.pipeline_mode<synchronous>, transform_indices = @transform_2, window_bounds = array<i64: 32, 16>}, {transform_indices = @transform_3, window_bounds = array<i64: 1, 4, 16, 16>}]} {
    %c0 = arith.constant 0 : index
    %c0_0 = arith.constant 0 : index
    %c0_1 = arith.constant 0 : index
    %c0_2 = arith.constant 0 : index
    %0 = tpu.strided_load %arg2[%c0, %c0_0, %c0_1, %c0_2] {strides = array<i32: 1, 1, 2, 1>} : memref<1x4x32x32xf32, #tpu.memory_space<vmem>>, vector<1x4x16x32xf32>
    %1 = vector.shape_cast %0 : vector<1x4x16x32xf32> to vector<4x16x32xf32>
    %c0_3 = arith.constant 0 : index
    %c0_4 = arith.constant 0 : index
    %c1 = arith.constant 1 : index
    %c0_5 = arith.constant 0 : index
    %2 = tpu.strided_load %arg2[%c0_3, %c0_4, %c1, %c0_5] {strides = array<i32: 1, 1, 2, 1>} : memref<1x4x32x32xf32, #tpu.memory_space<vmem>>, vector<1x4x16x32xf32>
    %3 = vector.shape_cast %2 : vector<1x4x16x32xf32> to vector<4x16x32xf32>
    %4 = arith.maximumf %1, %3 : vector<4x16x32xf32>
    %5 = arith.addf %1, %3 : vector<4x16x32xf32>
    %6 = vector.shape_cast %4 : vector<4x16x32xf32> to vector<64x32xf32>
    %7 = vector.shape_cast %5 : vector<4x16x32xf32> to vector<64x32xf32>
    %c0_6 = arith.constant 0 : index
    %c0_7 = arith.constant 0 : index
    %8 = vector.load %arg3[%c0_6, %c0_7] : memref<32x32xf32, #tpu.memory_space<vmem>>, vector<32x32xf32>
    %cst = arith.constant dense<0.000000e+00> : vector<64x32xf32>
    %9 = tpu.matmul %6, %8, %cst {dimension_numbers = #tpu.dot_dimension_numbers<[1], [0], [0], [1], [0, 0, 1, 1], [], []>} : vector<64x32xf32>, vector<32x32xf32>, vector<64x32xf32> -> vector<64x32xf32>
    %c0_8 = arith.constant 0 : index
    %c0_9 = arith.constant 0 : index
    %10 = vector.load %arg4[%c0_8, %c0_9] : memref<32x16xf32, #tpu.memory_space<vmem>>, vector<32x16xf32>
    %cst_10 = arith.constant dense<0.000000e+00> : vector<64x16xf32>
    %11 = tpu.matmul %7, %10, %cst_10 {dimension_numbers = #tpu.dot_dimension_numbers<[1], [0], [0], [1], [0, 0, 1, 1], [], []>} : vector<64x32xf32>, vector<32x16xf32>, vector<64x16xf32> -> vector<64x16xf32>
    %12 = vector.extract_strided_slice %9 {offsets = [0, 0], sizes = [64, 16], strides = [1, 1]} : vector<64x32xf32> to vector<64x16xf32>
    %13 = vector.extract_strided_slice %9 {offsets = [0, 16], sizes = [64, 16], strides = [1, 1]} : vector<64x32xf32> to vector<64x16xf32>
    %14 = arith.maximumf %12, %13 : vector<64x16xf32>
    %cst_11 = arith.constant 2.500000e-01 : f32
    %15 = vector.broadcast %cst_11 : f32 to vector<64x16xf32>
    %16 = arith.mulf %11, %15 : vector<64x16xf32>
    %17 = arith.addf %14, %16 : vector<64x16xf32>
    %18 = vector.shape_cast %17 : vector<64x16xf32> to vector<4x16x16xf32>
    %c0_12 = arith.constant 0 : index
    %c0_13 = arith.constant 0 : index
    %c0_14 = arith.constant 0 : index
    %c0_15 = arith.constant 0 : index
    %19 = vector.load %arg5[%c0_12, %c0_13, %c0_14, %c0_15] : memref<1x4x16x16xf32, #tpu.memory_space<vmem>>, vector<1x4x16x16xf32>
    %20 = vector.shape_cast %19 : vector<1x4x16x16xf32> to vector<4x16x16xf32>
    %21 = vector.shape_cast %18 : vector<4x16x16xf32> to vector<1x4x16x16xf32>
    tpu.vector_store %arg5[%c0_12, %c0_13, %c0_14, %c0_15], %21 {strides = array<i32>} : memref<1x4x16x16xf32, #tpu.memory_space<vmem>>, vector<1x4x16x16xf32>,
    return
  }
  func.func @transform_0(%arg0: i32, %arg1: i32) -> (i32, i32, i32, i32) {
    %c0_i32 = arith.constant 0 : i32
    %c0_i32_0 = arith.constant 0 : i32
    %c0_i32_1 = arith.constant 0 : i32
    return %arg0, %arg1, %c0_i32, %c0_i32_0 : i32, i32, i32, i32
  }
  func.func @transform_1(%arg0: i32, %arg1: i32) -> (i32, i32) {
    %c0_i32 = arith.constant 0 : i32
    %c0_i32_0 = arith.constant 0 : i32
    %c0_i32_1 = arith.constant 0 : i32
    return %c0_i32, %c0_i32_0 : i32, i32
  }
  func.func @transform_2(%arg0: i32, %arg1: i32) -> (i32, i32) {
    %c0_i32 = arith.constant 0 : i32
    %c0_i32_0 = arith.constant 0 : i32
    %c0_i32_1 = arith.constant 0 : i32
    return %c0_i32, %c0_i32_0 : i32, i32
  }
  func.func @transform_3(%arg0: i32, %arg1: i32) -> (i32, i32, i32, i32) {
    %c0_i32 = arith.constant 0 : i32
    %c0_i32_0 = arith.constant 0 : i32
    %c0_i32_1 = arith.constant 0 : i32
    return %arg0, %arg1, %c0_i32, %c0_i32_0 : i32, i32, i32, i32
  }
}

module attributes {stable_mosaic.version = 11 : i64} {
  func.func @_upsample_kernel(%arg0: i32, %arg1: i32, %arg2: memref<1x4x8x8xf32, #tpu.memory_space<vmem>>, %arg3: memref<8x16xf32, #tpu.memory_space<vmem>>, %arg4: memref<2x12x16x16xf32, #tpu.memory_space<any>>, %arg5: memref<1x4x16x16xf32, #tpu.memory_space<vmem>>) attributes {dimension_semantics = [#tpu.dimension_semantics<parallel>, #tpu.dimension_semantics<parallel>], iteration_bounds = array<i64: 2, 1>, scalar_prefetch = 0 : i64, scratch_operands = 0 : i64, tpu.core_type = #tpu.core_type<tc>, window_params = [{transform_indices = @transform_0, window_bounds = array<i64: 1, 4, 8, 8>}, {pipeline_mode = #tpu.pipeline_mode<synchronous>, transform_indices = @transform_1, window_bounds = array<i64: 8, 16>}, {}, {transform_indices = @transform_3, window_bounds = array<i64: 1, 4, 16, 16>}]} {
    %c0 = arith.constant 0 : index
    %c0_0 = arith.constant 0 : index
    %c0_1 = arith.constant 0 : index
    %c0_2 = arith.constant 0 : index
    %0 = vector.load %arg2[%c0, %c0_0, %c0_1, %c0_2] : memref<1x4x8x8xf32, #tpu.memory_space<vmem>>, vector<1x4x8x8xf32>
    %1 = vector.shape_cast %0 : vector<1x4x8x8xf32> to vector<4x8x8xf32>
    %2 = vector.shape_cast %1 : vector<4x8x8xf32> to vector<32x8xf32>
    %c0_3 = arith.constant 0 : index
    %c0_4 = arith.constant 0 : index
    %3 = vector.load %arg3[%c0_3, %c0_4] : memref<8x16xf32, #tpu.memory_space<vmem>>, vector<8x16xf32>
    %cst = arith.constant dense<0.000000e+00> : vector<32x16xf32>
    %4 = tpu.matmul %2, %3, %cst {dimension_numbers = #tpu.dot_dimension_numbers<[1], [0], [0], [1], [0, 0, 1, 1], [], []>} : vector<32x8xf32>, vector<8x16xf32>, vector<32x16xf32> -> vector<32x16xf32>
    %5 = vector.shape_cast %4 : vector<32x16xf32> to vector<4x8x16xf32>
    %6 = vector.extract_strided_slice %5 {offsets = [0, 0, 0], sizes = [4, 1, 16], strides = [1, 1, 1]} : vector<4x8x16xf32> to vector<4x1x16xf32>
    %7 = vector.shape_cast %6 : vector<4x1x16xf32> to vector<4x1x16xf32>
    %8 = vector.broadcast %7 : vector<4x1x16xf32> to vector<4x2x16xf32>
    %c0_5 = arith.constant 0 : index
    %c0_6 = arith.constant 0 : index
    %c0_7 = arith.constant 0 : index
    %c0_8 = arith.constant 0 : index
    %9 = vector.load %arg5[%c0_5, %c0_6, %c0_7, %c0_8] : memref<1x4x16x16xf32, #tpu.memory_space<vmem>>, vector<1x4x2x16xf32>
    %10 = vector.shape_cast %9 : vector<1x4x2x16xf32> to vector<4x2x16xf32>
    %11 = vector.shape_cast %8 : vector<4x2x16xf32> to vector<1x4x2x16xf32>
    tpu.vector_store %arg5[%c0_5, %c0_6, %c0_7, %c0_8], %11 {strides = array<i32>} : memref<1x4x16x16xf32, #tpu.memory_space<vmem>>, vector<1x4x2x16xf32>,
    %12 = vector.extract_strided_slice %5 {offsets = [0, 1, 0], sizes = [4, 1, 16], strides = [1, 1, 1]} : vector<4x8x16xf32> to vector<4x1x16xf32>
    %13 = vector.shape_cast %12 : vector<4x1x16xf32> to vector<4x1x16xf32>
    %14 = vector.broadcast %13 : vector<4x1x16xf32> to vector<4x2x16xf32>
    %c0_9 = arith.constant 0 : index
    %c0_10 = arith.constant 0 : index
    %c2 = arith.constant 2 : index
    %c0_11 = arith.constant 0 : index
    %15 = vector.load %arg5[%c0_9, %c0_10, %c2, %c0_11] : memref<1x4x16x16xf32, #tpu.memory_space<vmem>>, vector<1x4x2x16xf32>
    %16 = vector.shape_cast %15 : vector<1x4x2x16xf32> to vector<4x2x16xf32>
    %17 = vector.shape_cast %14 : vector<4x2x16xf32> to vector<1x4x2x16xf32>
    tpu.vector_store %arg5[%c0_9, %c0_10, %c2, %c0_11], %17 {strides = array<i32>} : memref<1x4x16x16xf32, #tpu.memory_space<vmem>>, vector<1x4x2x16xf32>,
    %18 = vector.extract_strided_slice %5 {offsets = [0, 2, 0], sizes = [4, 1, 16], strides = [1, 1, 1]} : vector<4x8x16xf32> to vector<4x1x16xf32>
    %19 = vector.shape_cast %18 : vector<4x1x16xf32> to vector<4x1x16xf32>
    %20 = vector.broadcast %19 : vector<4x1x16xf32> to vector<4x2x16xf32>
    %c0_12 = arith.constant 0 : index
    %c0_13 = arith.constant 0 : index
    %c4 = arith.constant 4 : index
    %c0_14 = arith.constant 0 : index
    %21 = vector.load %arg5[%c0_12, %c0_13, %c4, %c0_14] : memref<1x4x16x16xf32, #tpu.memory_space<vmem>>, vector<1x4x2x16xf32>
    %22 = vector.shape_cast %21 : vector<1x4x2x16xf32> to vector<4x2x16xf32>
    %23 = vector.shape_cast %20 : vector<4x2x16xf32> to vector<1x4x2x16xf32>
    tpu.vector_store %arg5[%c0_12, %c0_13, %c4, %c0_14], %23 {strides = array<i32>} : memref<1x4x16x16xf32, #tpu.memory_space<vmem>>, vector<1x4x2x16xf32>,
    %24 = vector.extract_strided_slice %5 {offsets = [0, 3, 0], sizes = [4, 1, 16], strides = [1, 1, 1]} : vector<4x8x16xf32> to vector<4x1x16xf32>
    %25 = vector.shape_cast %24 : vector<4x1x16xf32> to vector<4x1x16xf32>
    %26 = vector.broadcast %25 : vector<4x1x16xf32> to vector<4x2x16xf32>
    %c0_15 = arith.constant 0 : index
    %c0_16 = arith.constant 0 : index
    %c6 = arith.constant 6 : index
    %c0_17 = arith.constant 0 : index
    %27 = vector.load %arg5[%c0_15, %c0_16, %c6, %c0_17] : memref<1x4x16x16xf32, #tpu.memory_space<vmem>>, vector<1x4x2x16xf32>
    %28 = vector.shape_cast %27 : vector<1x4x2x16xf32> to vector<4x2x16xf32>
    %29 = vector.shape_cast %26 : vector<4x2x16xf32> to vector<1x4x2x16xf32>
    tpu.vector_store %arg5[%c0_15, %c0_16, %c6, %c0_17], %29 {strides = array<i32>} : memref<1x4x16x16xf32, #tpu.memory_space<vmem>>, vector<1x4x2x16xf32>,
    %30 = vector.extract_strided_slice %5 {offsets = [0, 4, 0], sizes = [4, 1, 16], strides = [1, 1, 1]} : vector<4x8x16xf32> to vector<4x1x16xf32>
    %31 = vector.shape_cast %30 : vector<4x1x16xf32> to vector<4x1x16xf32>
    %32 = vector.broadcast %31 : vector<4x1x16xf32> to vector<4x2x16xf32>
    %c0_18 = arith.constant 0 : index
    %c0_19 = arith.constant 0 : index
    %c8 = arith.constant 8 : index
    %c0_20 = arith.constant 0 : index
    %33 = vector.load %arg5[%c0_18, %c0_19, %c8, %c0_20] : memref<1x4x16x16xf32, #tpu.memory_space<vmem>>, vector<1x4x2x16xf32>
    %34 = vector.shape_cast %33 : vector<1x4x2x16xf32> to vector<4x2x16xf32>
    %35 = vector.shape_cast %32 : vector<4x2x16xf32> to vector<1x4x2x16xf32>
    tpu.vector_store %arg5[%c0_18, %c0_19, %c8, %c0_20], %35 {strides = array<i32>} : memref<1x4x16x16xf32, #tpu.memory_space<vmem>>, vector<1x4x2x16xf32>,
    %36 = vector.extract_strided_slice %5 {offsets = [0, 5, 0], sizes = [4, 1, 16], strides = [1, 1, 1]} : vector<4x8x16xf32> to vector<4x1x16xf32>
    %37 = vector.shape_cast %36 : vector<4x1x16xf32> to vector<4x1x16xf32>
    %38 = vector.broadcast %37 : vector<4x1x16xf32> to vector<4x2x16xf32>
    %c0_21 = arith.constant 0 : index
    %c0_22 = arith.constant 0 : index
    %c10 = arith.constant 10 : index
    %c0_23 = arith.constant 0 : index
    %39 = vector.load %arg5[%c0_21, %c0_22, %c10, %c0_23] : memref<1x4x16x16xf32, #tpu.memory_space<vmem>>, vector<1x4x2x16xf32>
    %40 = vector.shape_cast %39 : vector<1x4x2x16xf32> to vector<4x2x16xf32>
    %41 = vector.shape_cast %38 : vector<4x2x16xf32> to vector<1x4x2x16xf32>
    tpu.vector_store %arg5[%c0_21, %c0_22, %c10, %c0_23], %41 {strides = array<i32>} : memref<1x4x16x16xf32, #tpu.memory_space<vmem>>, vector<1x4x2x16xf32>,
    %42 = vector.extract_strided_slice %5 {offsets = [0, 6, 0], sizes = [4, 1, 16], strides = [1, 1, 1]} : vector<4x8x16xf32> to vector<4x1x16xf32>
    %43 = vector.shape_cast %42 : vector<4x1x16xf32> to vector<4x1x16xf32>
    %44 = vector.broadcast %43 : vector<4x1x16xf32> to vector<4x2x16xf32>
    %c0_24 = arith.constant 0 : index
    %c0_25 = arith.constant 0 : index
    %c12 = arith.constant 12 : index
    %c0_26 = arith.constant 0 : index
    %45 = vector.load %arg5[%c0_24, %c0_25, %c12, %c0_26] : memref<1x4x16x16xf32, #tpu.memory_space<vmem>>, vector<1x4x2x16xf32>
    %46 = vector.shape_cast %45 : vector<1x4x2x16xf32> to vector<4x2x16xf32>
    %47 = vector.shape_cast %44 : vector<4x2x16xf32> to vector<1x4x2x16xf32>
    tpu.vector_store %arg5[%c0_24, %c0_25, %c12, %c0_26], %47 {strides = array<i32>} : memref<1x4x16x16xf32, #tpu.memory_space<vmem>>, vector<1x4x2x16xf32>,
    %48 = vector.extract_strided_slice %5 {offsets = [0, 7, 0], sizes = [4, 1, 16], strides = [1, 1, 1]} : vector<4x8x16xf32> to vector<4x1x16xf32>
    %49 = vector.shape_cast %48 : vector<4x1x16xf32> to vector<4x1x16xf32>
    %50 = vector.broadcast %49 : vector<4x1x16xf32> to vector<4x2x16xf32>
    %c0_27 = arith.constant 0 : index
    %c0_28 = arith.constant 0 : index
    %c14 = arith.constant 14 : index
    %c0_29 = arith.constant 0 : index
    %51 = vector.load %arg5[%c0_27, %c0_28, %c14, %c0_29] : memref<1x4x16x16xf32, #tpu.memory_space<vmem>>, vector<1x4x2x16xf32>
    %52 = vector.shape_cast %51 : vector<1x4x2x16xf32> to vector<4x2x16xf32>
    %53 = vector.shape_cast %50 : vector<4x2x16xf32> to vector<1x4x2x16xf32>
    tpu.vector_store %arg5[%c0_27, %c0_28, %c14, %c0_29], %53 {strides = array<i32>} : memref<1x4x16x16xf32, #tpu.memory_space<vmem>>, vector<1x4x2x16xf32>,
    return
  }
  func.func @transform_0(%arg0: i32, %arg1: i32) -> (i32, i32, i32, i32) {
    %c0_i32 = arith.constant 0 : i32
    %c0_i32_0 = arith.constant 0 : i32
    %c0_i32_1 = arith.constant 0 : i32
    return %arg0, %arg1, %c0_i32, %c0_i32_0 : i32, i32, i32, i32
  }
  func.func @transform_1(%arg0: i32, %arg1: i32) -> (i32, i32) {
    %c0_i32 = arith.constant 0 : i32
    %c0_i32_0 = arith.constant 0 : i32
    %c0_i32_1 = arith.constant 0 : i32
    return %c0_i32, %c0_i32_0 : i32, i32
  }
  func.func @transform_3(%arg0: i32, %arg1: i32) -> (i32, i32, i32, i32) {
    %c2_i32 = arith.constant 2 : i32
    %0 = arith.addi %c2_i32, %arg1 : i32
    %c0_i32 = arith.constant 0 : i32
    %c0_i32_0 = arith.constant 0 : i32
    %c0_i32_1 = arith.constant 0 : i32
    return %arg0, %0, %c0_i32, %c0_i32_0 : i32, i32, i32, i32
  }
}

</mosaic_0001>

<bundles_post_ra>
// kernel: zoom_cat.4
= control target key start
LH: loop header
LB: loop body
LE: loop exit
PB: predicated region body
PF: predicated region fallthrough
CT: control target
= control target key end

     0   :  { %7 = vsyncpa [#allocation3], 0  ;;  %s566_s0 = inlined_call_operand.hbm [shape: f32[2,4,16,16], index: 0, kind: input, shape index: {}]   ;;  %s567_s1 = inlined_call_operand.vmem [shape: f32[2,12,16,16], index: 1, kind: input, shape index: {}, may-alias: {1,2}]   ;;  %s568_s2 = inlined_call_operand.vmem [shape: f32[2,12,16,16], index: 2, kind: output, shape index: {}, may-alias: {1,2}]  }
   0x1   :  { %9 = vsyncpa [#allocation3 + $0x1], 0  ;;  %s470_s9 = smov 0   ;;  %s472_s10 = smov 0  }
   0x2   :  { %s474_s11 = smov 0   ;;  %s476_s12 = smov 0  }
   0x3   :  { %s478_s13 = smov 0   ;;  %s480_s14 = smov 0  }
   0x4 LB: > { %s297_s1 = sadd.s32 4294967295, %s451_s14   ;;  %s27_s15 = sadd.s32 1, %s447_s13  ;;  %s451_s14 = sphi %s480_s14, %s15_s14   ;;  %s447_s13 = sphi %s478_s13, %s575_s13   ;;  %s443_s12 = sphi %s476_s12, %s574_s12   ;;  %s439_s11 = sphi %s474_s11, %s573_s11   ;;  %s435_s10 = sphi %s472_s10, %s572_s10   ;;  %s431_s9 = sphi %s470_s9, %s571_s9  }
   0x5   : > { %p29_p0 = scmp.ge.s32.totalorder %s27_s15, 2  ;;  %s36_s16 = sadd.s32 1, %s439_s11 }
   0x6   : > { %p43_p1 = scmp.ne.s32.totalorder %s439_s11, %s435_s10  ;;  %p44_p2 = scmp.eq.s32.totalorder %s451_s14, 0 }
   0x7   : > { %s577_s15 = smov (%p29_p0, %s27_s15), 0  ;;  %p49_p4 = scmp.ne.s32.totalorder %s435_s10, %s431_s9 }
   0x8   : > { %p506_p3 = por %p44_p2, %p43_p1  ;;  %s31_s18 = ssub.s32 %s447_s13, %s577_s15 }
   0x9   : > { %p50_p5 = scmp.eq.s32.totalorder %s297_s1, 0  ;;  %p34_p6 = scmp.eq.s32.totalorder %s31_s18, 0 }
   0xa   : > { %p319_p8 = scmp.lt.s32.totalorder %s451_s14, 2  ;;  %s103_s21 = sand.u32 1, %s439_s11  }
   0xb   : > { %p513_p7 = por %p50_p5, %p49_p4  ;;  %s309_s22 = sshll.u32 %s447_s13, 6 }
   0xc   : > { %s519_s20 = scalar_select %p34_p6, %s439_s11, %s36_s16  }
   0xd   : > { %s301_s23 = sshll.u32 %s103_s21, 6  ;;  %s115_s26 = scalar_lea.hbm %s566_s0, %s309_s22 }
   0xe   : > { %s116_s27 = sshll.u32 %s115_s26, 4  ;;  %s107_s28 = scalar_lea.vmem [#allocation2], %s301_s23  ;;  %s117_s27 = int_to_ptr.hbm [resolvable:$true] %s116_s27 }
   0xf   : > { %s118_s29 = sshll.u32 %s107_s28, 4  ;;  %p316_p9 = pnand %p319_p8, %p506_p3  ;;  %s119_s29 = int_to_ptr.vmem [resolvable:$true] %s118_s29 }
  0x10   : > { %p304_p10 = scmp.ge.s32.totalorder %s451_s14, 1  ;;  %p126_p11 = scmp.lt.s32.totalorder %s451_s14, 3 }
  0x11   : > { %s104_s30 = scalar_lea.sflag [#allocation3], %s103_s21  ;;  %s453_s3 = smov 128  }
  0x12   : > { %s454_s4 = smov 8   ;;  %p127_p12 = pnand %p304_p10, %p126_p11 }
  0x13   : > { %318 = dma.hbm_to_vmem [thread:$0]  (!%p316_p9), %s117_s27, 1024, %s119_s29, %s104_s30, %s453_s3, %s453_s3, %s454_s4  }
  0x14   : > { %130 = sbr.rel (%p127_p12) target bundleno = 41 (0x29), region = 24  ;;  %s132_s5 = sand.u32 (!%p127_p12), 1, %s435_s10  }
  0x15   : > { %s305_s6 = sshll.u32 (!%p127_p12), %s132_s5, 6  ;;  %s133_s7 = scalar_lea.sflag (!%p127_p12), [#allocation3], %s132_s5 }
  0x16   : > { %s136_s8 = scalar_lea.vmem (!%p127_p12), [#allocation2], %s305_s6 }
  0x19   : > { %426 = dma.done.wait (%p513_p7), %s133_s7, 1024  }
  0x1a   : > { %428 = vsyncadd (%p513_p7), %s133_s7, 4294966272  ;;  %p165_p13 = scmp.lt.s32.totalorder %s443_s12, 1  ;;  %vm184_vm0 = vcmask 130048   ;;  %v176_v0 = vld [vmem:[%s136_s8] sm:$0xff]  ;;  %v177_v1 = vld [vmem:[%s136_s8 + $0x8] sm:$0xff] }
  0x1b   : > { %v178_v2 = vld [vmem:[%s136_s8 + $0x10] sm:$0xff]  ;;  %v179_v3 = vld [vmem:[%s136_s8 + $0x18] sm:$0xff]  ;;  %v180_v4 = vld [vmem:[%s136_s8 + $0x20] sm:$0xff] }
  0x1c   : > { %s579_s12 = smov (!%p165_p13, %s443_s12), 1  ;;  %v181_v5 = vld [vmem:[%s136_s8 + $0x28] sm:$0xff]  ;;  %v182_v6 = vld [vmem:[%s136_s8 + $0x30] sm:$0xff]  ;;  %v183_v7 = vld [vmem:[%s136_s8 + $0x38] sm:$0xff] }
  0x1d   : > { %s320_s9 = smul.u32 192, %s579_s12 }
  0x1f   : > { %s311_s1 = sadd.s32 64, %s320_s9 }
  0x20   : > { %s173_s18 = scalar_lea.vmem %s568_s2, %s311_s1 }
  0x21   : > { %185 = vst.msk [vmem:[%s173_s18] sm:$0xff] %vm184_vm0, %v176_v0 }
  0x22   : > { %186 = vst.msk [vmem:[%s173_s18 + $0x8] sm:$0xff] %vm184_vm0, %v177_v1 }
  0x23   : > { %187 = vst.msk [vmem:[%s173_s18 + $0x10] sm:$0xff] %vm184_vm0, %v178_v2 }
  0x24   : > { %188 = vst.msk [vmem:[%s173_s18 + $0x18] sm:$0xff] %vm184_vm0, %v179_v3 }
  0x25   : > { %189 = vst.msk [vmem:[%s173_s18 + $0x20] sm:$0xff] %vm184_vm0, %v180_v4 }
  0x26   : > { %190 = vst.msk [vmem:[%s173_s18 + $0x28] sm:$0xff] %vm184_vm0, %v181_v5 }
  0x27   : > { %191 = vst.msk [vmem:[%s173_s18 + $0x30] sm:$0xff] %vm184_vm0, %v182_v6 }
  0x28   : > { %192 = vst.msk [vmem:[%s173_s18 + $0x38] sm:$0xff] %vm184_vm0, %v183_v7 }
  0x29 PF: > { %s15_s14 = sadd.s32 1, %s451_s14   ;;  %s571_s9 = smov %s435_s10 }
  0x2a   : > { %p12_p0 = scmp.ge.s32.totalorder %s15_s14, 4   ;;  %s572_s10 = smov %s439_s11 }
  0x2b   : > { %s573_s11 = smov %s519_s20  ;;  %s574_s12 = smov %s447_s13 }
  0x2c   : > { %s575_s13 = smov %s577_s15  ;;  %14 = sbr.rel (!%p12_p0) target bundleno = 4 (0x4), region = 64 }
  0x31   :  { %228 = vsyncpa [#allocation3], 1 }
  0x32   :  { %230 = vsyncpa [#allocation3 + $0x1], 1 }

// kernel: zoom_cat.5
= control target key start
LH: loop header
LB: loop body
LE: loop exit
PB: predicated region body
PF: predicated region fallthrough
CT: control target
= control target key end

     0   :  { %8 = vsyncpa [#allocation3], 0  ;;  %s929_s0 = inlined_call_operand.hbm [shape: f32[2,4,8,8], index: 0, kind: input, shape index: {}]   ;;  %s930_s1 = inlined_call_operand.hbm [shape: f32[8,16], index: 1, kind: input, shape index: {}]   ;;  %s931_s2 = inlined_call_operand.hbm [shape: f32[2,12,16,16], index: 2, kind: input, shape index: {}, may-alias: {2,3}]   ;;  %s932_s3 = inlined_call_operand.hbm [shape: f32[2,12,16,16], index: 3, kind: output, shape index: {}, may-alias: {2,3}]  }
   0x1   :  { %10 = vsyncpa [#allocation3 + $0x1], 0 }
   0x2   :  { %11 = vsyncpa [#allocation6], 0 }
   0x3   :  { %12 = vsyncpa [#allocation4], 0 }
   0x4   :  { %14 = vsyncpa [#allocation4 + $0x1], 0  ;;  %s707_s12 = smov 0   ;;  %s709_s13 = smov 0  }
   0x5   :  { %s711_s14 = smov 0   ;;  %s713_s15 = smov 0  }
   0x6   :  { %s715_s16 = smov 0   ;;  %s717_s17 = smov 0  }
   0x7 LB: > { %s433_s2 = sadd.s32 4294967295, %s680_s17   ;;  %s434_s18 = sadd.s32 4294967294, %s680_s17   ;;  %s680_s17 = sphi %s717_s17, %s20_s17   ;;  %s676_s16 = sphi %s715_s16, %s944_s16   ;;  %s672_s15 = sphi %s713_s15, %s943_s15   ;;  %s668_s14 = sphi %s711_s14, %s942_s14   ;;  %s664_s13 = sphi %s709_s13, %s941_s13   ;;  %s660_s12 = sphi %s707_s12, %s940_s12  }
   0x8   : > { %s41_s19 = sadd.s32 1, %s668_s14  ;;  %p48_p0 = scmp.ne.s32.totalorder %s668_s14, %s664_s13 }
   0x9   : > { %p49_p1 = scmp.eq.s32.totalorder %s680_s17, 0  ;;  %p54_p2 = scmp.ne.s32.totalorder %s664_s13, %s660_s12 }
   0xa   : > { %p745_p3 = scmp.eq.s32.totalorder %s433_s2, 0  ;;  %p103_p4 = scmp.eq.s32.totalorder %s433_s2, 1 }
   0xb   : > { %p749_p5 = por %p49_p1, %p48_p0  ;;  %p109_p6 = scmp.eq.s32.totalorder %s434_s18, 1 }
   0xc   : > { %p755_p7 = por %p745_p3, %p54_p2  ;;  %p759_p8 = por %p103_p4, %p48_p0 }
   0xd   : > { %p763_p9 = por %p109_p6, %p54_p2  ;;  %p435_p10 = scmp.ge.s32.totalorder %s680_s17, 1 }
   0xe   : > { %p116_p11 = scmp.lt.s32.totalorder %s680_s17, 3  ;;  %s128_s27 = sshll.u32 %s930_s1, 4  ;;  %s129_s27 = int_to_ptr.hbm [resolvable:$true] %s128_s27 }
   0xf   : > { %s682_s29 = smov [#allocation5]   ;;  %p437_p13 = scmp.ge.s32.totalorder %s680_s17, 2 }
  0x10   : > { %p772_p12 = pnand %p435_p10, %p116_p11  ;;  %s130_s30 = sshll.u32 %s682_s29, 4  ;;  %s131_s30 = int_to_ptr.vmem [resolvable:$true] %s130_s30 }
  0x11   : > { %p478_p1 = scmp.lt.s32.totalorder %s680_s17, 2  ;;  %s32_s5 = sadd.s32 1, %s676_s16 }
  0x12   : > { %p465_p0 = pneg %p772_p12  ;;  %p34_p6 = scmp.ge.s32.totalorder %s32_s5, 2 }
  0x13   : > { %p784_p4 = pnand %p478_p1, %p749_p5  ;;  %s141_s6 = sand.u32 1, %s668_s14  }
  0x14   : > { %p466_p2 = pnand %p465_p0, %p745_p3  ;;  %s946_s5 = smov (%p34_p6, %s32_s5), 0 }
  0x15   : > { %s438_s7 = sshll.u32 %s141_s6, 5  ;;  %s36_s8 = ssub.s32 %s676_s16, %s946_s5 }
  0x16   : > { %468 = dma.hbm_to_vmem [thread:$0]  (!%p466_p2), %s129_s27, 128, %s131_s30, [#allocation6]  }
  0x17   : > { %p39_p10 = scmp.eq.s32.totalorder %s36_s8, 0  ;;  %s453_s9 = sshll.u32 %s676_s16, 5 }
  0x18   : > { %s152_s2 = scalar_lea.hbm %s929_s0, %s453_s9  ;;  %s145_s18 = scalar_lea.vmem [#allocation2], %s438_s7 }
  0x19   : > { %s155_s21 = sshll.u32 %s145_s18, 4  ;;  %s153_s26 = sshll.u32 %s152_s2, 4  ;;  %s156_s21 = int_to_ptr.vmem [resolvable:$true] %s155_s21  ;;  %s154_s26 = int_to_ptr.hbm [resolvable:$true] %s153_s26 }
  0x1a   : > { %s801_s25 = scalar_select %p39_p10, %s668_s14, %s41_s19  }
  0x1b   : > { %s142_s27 = scalar_lea.sflag [#allocation3], %s141_s6  ;;  %s683_s29 = smov 128  }
  0x1c   : > { %s684_s30 = smov 8   ;;  %167 = sbr.rel (%p772_p12) target bundleno = 203 (0xcb), region = 28 }
  0x1d   : > { %472 = dma.hbm_to_vmem [thread:$0]  (!%p784_p4), %s154_s26, 512, %s156_s21, %s142_s27, %s683_s29, %s683_s29, %s684_s30  }
  0x1e   : > { %s808_s8 = sand.u32 (!%p772_p12), 1, %s664_s13  }
  0x1f   : > { %s442_s7 = sshll.u32 (!%p772_p12), %s808_s8, 5  ;;  %s170_s19 = scalar_lea.sflag (!%p772_p12), [#allocation3], %s808_s8 }
  0x20   : > { %s173_s9 = scalar_lea.vmem (!%p772_p12), [#allocation2], %s442_s7 }
  0x21   : > { %647 = dma.done.wait (%p755_p7), %s170_s19, 512  }
  0x22   : > { %649 = vsyncadd (%p755_p7), %s170_s19, 4294966784 }
  0x23   : > { %651 = dma.done.wait (%p745_p3), [#allocation6], 128  }
  0x24   : > { %653 = vsyncadd (%p745_p3), [#allocation6], 4294967168  ;;  %vm208_vm0 = vcmask 64512   ;;  %v207_v0 = vld [vmem:[#allocation5] sm:$0xff]  ;;  %v205_v1 = vld [vmem:[%s173_s9 + $0x10] sm:$0xff]  ;;  %s444_s22 = sshll.u32 %s808_s8, 6 }
  0x25   : > { %v206_v2 = vld [vmem:[%s173_s9 + $0x18] sm:$0xff]  ;;  %455 = vmatpush.msra.mxu2 %v207_v0  ;;  %456 = vmatpush.msra.mxu3 %v207_v0  ;;  %v203_v3 = vld [vmem:[%s173_s9] sm:$0xff]  ;;  %v204_v4 = vld [vmem:[%s173_s9 + $0x8] sm:$0xff]  ;;  %vm254_vm1 = vcmask 123904   ;;  %s821_s20 = scalar_lea.vmem [#allocation7], %s444_s22  ;;  %s450_s28 = smul.u32 192, %s672_s15 }
  0x26   : > { %447 = vmatmul.msk.f32.vlgmr.msra.gmra.mxu2 %vm208_vm0, %v205_v1  ;;  %448 = vmatmul.msk.f32.vlgmr.msra.gmra.mxu3 %vm208_vm0, %v206_v2  ;;  %s332_s11 = sshll.u32 %s821_s20, 4  ;;  %s316_s18 = scalar_lea.sflag [#allocation4], %s808_s8  ;;  %s333_s11 = int_to_ptr.vmem [resolvable:$true] %s332_s11 }
  0x27   : > { %236 = vmatpush.msra.mxu0 %v207_v0  ;;  %454 = vmatpush.msra.mxu1 %v207_v0  ;;  %s387_s15 = scalar_lea.hbm %s932_s3, %s450_s28  ;;  %s614_s30 = scalar_lea.hbm %s932_s3, 384 }
  0x28   : > { %445 = vmatmul.msk.f32.vlgmr.msra.gmra.mxu0 %vm208_vm0, %v203_v3  ;;  %446 = vmatmul.msk.f32.vlgmr.msra.gmra.mxu1 %vm208_vm0, %v204_v4  ;;  %s388_s10 = scalar_lea.hbm %s387_s15, 128 }
  0x29   : > { %s880_s2 = sshll.u32 %s388_s10, 4  ;;  %s335_s2 = int_to_ptr.hbm [resolvable:$true] %s880_s2 }
  0x2a   : > { %s608_s21 = sshra.s32 %s335_s2, 4  ;;  %s609_s21 = int_to_ptr.hbm [resolvable:$true] %s608_s21 }
  0x2b   : > { %s610_s26 = scalar_lea.hbm %s609_s21, 64  ;;  %p615_p11 = scmp.lt.s32.totalorder %s609_s21, %s932_s3 }
  0x2c   : > { %p611_p3 = scmp.ne.s32.totalorder %s609_s21, %s610_s26  ;;  %p616_p12 = scmp.lt.s32.totalorder %s614_s30, %s610_s26 }
  0x2e   : > { %p612_p5 = pnand %p611_p3, %p759_p8  ;;  %p617_p0 = por %p616_p12, %p615_p11 }
  0x30   : > { %p613_p7 = pneg %p612_p5 }
  0x32   : > { %p618_p1 = pnand %p617_p0, %p613_p7 }
  0xa5   : > { %v238_v5 = vpop.f32.mrf.mxu0  ;;  %v241_v12 = vpop.f32.mrf.mxu1 }
  0xa6   : > { %v250_v6 = vperm.slane %v238_v5, 0  ;;  %v259_v7 = vperm.slane %v238_v5, 1  ;;  %v267_v8 = vperm.slane %v238_v5, 2  ;;  %v275_v9 = vperm.slane %v238_v5, 3 }
  0xa7   : > { %v283_v10 = vperm.slane %v238_v5, 4  ;;  %v291_v11 = vperm.slane %v238_v5, 5  ;;  %v299_v13 = vperm.slane %v238_v5, 6  ;;  %v307_v14 = vperm.slane %v238_v5, 7 }
  0xa8   : > { %255 = vst.msk [vmem:[%s821_s20] sm:$0x3] %vm254_vm1, %v250_v6  ;;  %v251_v15 = vperm.slane %v241_v12, 0  ;;  %v260_v16 = vperm.slane %v241_v12, 1  ;;  %v268_v17 = vperm.slane %v241_v12, 2  ;;  %v276_v18 = vperm.slane %v241_v12, 3 }
  0xa9   : > { %263 = vst.msk [vmem:[%s821_s20 + $0x2] sm:$0x3] %vm254_vm1, %v259_v7  ;;  %v284_v19 = vperm.slane %v241_v12, 4  ;;  %v292_v20 = vperm.slane %v241_v12, 5  ;;  %v244_v21 = vpop.f32.mrf.mxu2  ;;  %v300_v22 = vperm.slane %v241_v12, 6  ;;  %v308_v23 = vperm.slane %v241_v12, 7  ;;  %v247_v30 = vpop.f32.mrf.mxu3 }
  0xaa   : > { %271 = vst.msk [vmem:[%s821_s20 + $0x4] sm:$0x3] %vm254_vm1, %v267_v8  ;;  %v252_v24 = vperm.slane %v244_v21, 0  ;;  %v261_v25 = vperm.slane %v244_v21, 1  ;;  %v269_v26 = vperm.slane %v244_v21, 2  ;;  %v277_v27 = vperm.slane %v244_v21, 3 }
  0xab   : > { %279 = vst.msk [vmem:[%s821_s20 + $0x6] sm:$0x3] %vm254_vm1, %v275_v9  ;;  %v285_v28 = vperm.slane %v244_v21, 4  ;;  %v293_v29 = vperm.slane %v244_v21, 5  ;;  %v301_v31 = vperm.slane %v244_v21, 6  ;;  %v309_v32 = vperm.slane %v244_v21, 7 }
  0xac   : > { %287 = vst.msk [vmem:[%s821_s20 + $0x8] sm:$0x3] %vm254_vm1, %v283_v10  ;;  %v253_v33 = vperm.slane %v247_v30, 0  ;;  %v262_v34 = vperm.slane %v247_v30, 1  ;;  %v270_v35 = vperm.slane %v247_v30, 2  ;;  %v278_v36 = vperm.slane %v247_v30, 3 }
  0xad   : > { %295 = vst.msk [vmem:[%s821_s20 + $0xa] sm:$0x3] %vm254_vm1, %v291_v11  ;;  %v286_v37 = vperm.slane %v247_v30, 4  ;;  %v294_v38 = vperm.slane %v247_v30, 5  ;;  %v302_v39 = vperm.slane %v247_v30, 6  ;;  %v310_v40 = vperm.slane %v247_v30, 7 }
  0xae   : > { %303 = vst.msk [vmem:[%s821_s20 + $0xc] sm:$0x3] %vm254_vm1, %v299_v13 }
  0xaf   : > { %311 = vst.msk [vmem:[%s821_s20 + $0xe] sm:$0x3] %vm254_vm1, %v307_v14 }
  0xb0   : > { %256 = vst.msk [vmem:[%s821_s20 + $0x10] sm:$0x3] %vm254_vm1, %v251_v15 }
  0xb1   : > { %264 = vst.msk [vmem:[%s821_s20 + $0x12] sm:$0x3] %vm254_vm1, %v260_v16 }
  0xb2   : > { %272 = vst.msk [vmem:[%s821_s20 + $0x14] sm:$0x3] %vm254_vm1, %v268_v17 }
  0xb3   : > { %280 = vst.msk [vmem:[%s821_s20 + $0x16] sm:$0x3] %vm254_vm1, %v276_v18 }
  0xb4   : > { %288 = vst.msk [vmem:[%s821_s20 + $0x18] sm:$0x3] %vm254_vm1, %v284_v19 }
  0xb5   : > { %296 = vst.msk [vmem:[%s821_s20 + $0x1a] sm:$0x3] %vm254_vm1, %v292_v20 }
  0xb6   : > { %304 = vst.msk [vmem:[%s821_s20 + $0x1c] sm:$0x3] %vm254_vm1, %v300_v22 }
  0xb7   : > { %312 = vst.msk [vmem:[%s821_s20 + $0x1e] sm:$0x3] %vm254_vm1, %v308_v23 }
  0xb8   : > { %257 = vst.msk [vmem:[%s821_s20 + $0x20] sm:$0x3] %vm254_vm1, %v252_v24 }
  0xb9   : > { %265 = vst.msk [vmem:[%s821_s20 + $0x22] sm:$0x3] %vm254_vm1, %v261_v25 }
  0xba   : > { %273 = vst.msk [vmem:[%s821_s20 + $0x24] sm:$0x3] %vm254_vm1, %v269_v26 }
  0xbb   : > { %281 = vst.msk [vmem:[%s821_s20 + $0x26] sm:$0x3] %vm254_vm1, %v277_v27 }
  0xbc   : > { %289 = vst.msk [vmem:[%s821_s20 + $0x28] sm:$0x3] %vm254_vm1, %v285_v28 }
  0xbd   : > { %297 = vst.msk [vmem:[%s821_s20 + $0x2a] sm:$0x3] %vm254_vm1, %v293_v29 }
  0xbe   : > { %305 = vst.msk [vmem:[%s821_s20 + $0x2c] sm:$0x3] %vm254_vm1, %v301_v31 }
  0xbf   : > { %313 = vst.msk [vmem:[%s821_s20 + $0x2e] sm:$0x3] %vm254_vm1, %v309_v32 }
  0xc0   : > { %258 = vst.msk [vmem:[%s821_s20 + $0x30] sm:$0x3] %vm254_vm1, %v253_v33 }
  0xc1   : > { %266 = vst.msk [vmem:[%s821_s20 + $0x32] sm:$0x3] %vm254_vm1, %v262_v34 }
  0xc2   : > { %274 = vst.msk [vmem:[%s821_s20 + $0x34] sm:$0x3] %vm254_vm1, %v270_v35 }
  0xc3   : > { %282 = vst.msk [vmem:[%s821_s20 + $0x36] sm:$0x3] %vm254_vm1, %v278_v36 }
  0xc4   : > { %290 = vst.msk [vmem:[%s821_s20 + $0x38] sm:$0x3] %vm254_vm1, %v286_v37 }
  0xc5   : > { %298 = vst.msk [vmem:[%s821_s20 + $0x3a] sm:$0x3] %vm254_vm1, %v294_v38 }
  0xc6   : > { %306 = vst.msk [vmem:[%s821_s20 + $0x3c] sm:$0x3] %vm254_vm1, %v302_v39 }
  0xc7   : > { %314 = vst.msk [vmem:[%s821_s20 + $0x3e] sm:$0x3] %vm254_vm1, %v310_v40 }
  0xc8   : > { %621 = shalt.err (!%p618_p1)
}
  0xc9   : > { %s685_s8 = smov 128   ;;  %s686_s9 = smov 8  }
  0xca   : > { %463 = dma.vmem_to_hbm [thread:$0]  (%p759_p8), %s333_s11, 1024, %s335_s2, %s316_s18, %s685_s8, %s685_s8, %s686_s9  }
  0xcb PF: > { %s349_s22 = sand.u32 1, %s660_s12   ;;  %p474_p2 = pnand %p437_p13, %p763_p9 }
  0xcc   : > { %s350_s20 = scalar_lea.sflag [#allocation4], %s349_s22 }
  0xcd   : > { %p475_p4 = pneg %p474_p2 }
  0xcf   : > { %655 = dma.done.wait (%p475_p4), %s350_s20, 1024  }
  0xd0   : > { %657 = vsyncadd (%p475_p4), %s350_s20, 4294966272  ;;  %s20_s17 = sadd.s32 1, %s680_s17   ;;  %s940_s12 = smov %s664_s13 }
  0xd1   : > { %p17_p6 = scmp.ge.s32.totalorder %s20_s17, 4   ;;  %s941_s13 = smov %s668_s14 }
  0xd2   : > { %s942_s14 = smov %s801_s25  ;;  %s943_s15 = smov %s676_s16 }
  0xd3   : > { %s944_s16 = smov %s946_s5  ;;  %19 = sbr.rel (!%p17_p6) target bundleno = 7 (0x7), region = 77 }
  0xd8   :  { %356 = vsyncpa [#allocation3], 1 }
  0xd9   :  { %358 = vsyncpa [#allocation3 + $0x1], 1 }
  0xda   :  { %359 = vsyncpa [#allocation6], 1 }
  0xdb   :  { %360 = vsyncpa [#allocation4], 1 }
  0xdc   :  { %362 = vsyncpa [#allocation4 + $0x1], 1 }

// kernel: zoom_cat.3
= control target key start
LH: loop header
LB: loop body
LE: loop exit
PB: predicated region body
PF: predicated region fallthrough
CT: control target
= control target key end

     0   :  { %8 = vsyncpa [#allocation3], 0  ;;  %s1112_s0 = inlined_call_operand.hbm [shape: f32[2,4,32,32], index: 0, kind: input, shape index: {}]   ;;  %s1113_s1 = inlined_call_operand.hbm [shape: f32[32,32], index: 1, kind: input, shape index: {}]   ;;  %s1114_s2 = inlined_call_operand.hbm [shape: f32[32,16], index: 2, kind: input, shape index: {}]   ;;  %s1115_s3 = inlined_call_operand.vmem [shape: f32[2,12,16,16], index: 3, kind: output, shape index: {}]  }
   0x1   :  { %10 = vsyncpa [#allocation3 + $0x1], 0 }
   0x2   :  { %11 = vsyncpa [#allocation5], 0  ;;  %s935_s12 = smov 0   ;;  %s937_s13 = smov 0  }
   0x3   :  { %s939_s14 = smov 0   ;;  %s941_s15 = smov 0  }
   0x4   :  { %s943_s16 = smov 0   ;;  %s945_s17 = smov 0  }
   0x5 LB: > { %s628_s18 = sadd.s32 4294967295, %s908_s17   ;;  %p51_p0 = scmp.ne.s32.totalorder %s892_s13, %s888_s12  ;;  %s908_s17 = sphi %s945_s17, %s17_s17   ;;  %s904_s16 = sphi %s943_s16, %s1124_s16   ;;  %s900_s15 = sphi %s941_s15, %s1123_s15   ;;  %s896_s14 = sphi %s939_s14, %s1122_s14   ;;  %s892_s13 = sphi %s937_s13, %s1121_s13   ;;  %s888_s12 = sphi %s935_s12, %s1120_s12  }
   0x6   : > { %p965_p1 = scmp.eq.s32.totalorder %s628_s18, 0  ;;  %p630_p2 = scmp.ge.s32.totalorder %s908_s17, 1 }
   0x7   : > { %p132_p3 = scmp.lt.s32.totalorder %s908_s17, 3  ;;  %s143_s23 = sshll.u32 %s1113_s1, 4  ;;  %s144_s23 = int_to_ptr.hbm [resolvable:$true] %s143_s23 }
   0x8   : > { %p973_p4 = por %p965_p1, %p51_p0  ;;  %s910_s25 = smov [#allocation4]  }
   0x9   : > { %p980_p5 = pnand %p630_p2, %p132_p3  ;;  %s145_s26 = sshll.u32 %s910_s25, 4  ;;  %s146_s26 = int_to_ptr.vmem [resolvable:$true] %s145_s26 }
   0xa   : > { %s157_s29 = sshll.u32 %s1114_s2, 4  ;;  %s911_s30 = smov 128   ;;  %s158_s29 = int_to_ptr.hbm [resolvable:$true] %s157_s29 }
   0xb   : > { %p695_p6 = pneg %p980_p5  ;;  %s912_s4 = smov 8  }
   0xc   : > { %s913_s5 = smov [#allocation6]   ;;  %s29_s7 = sadd.s32 1, %s904_s16 }
   0xd   : > { %p696_p7 = pnand %p695_p6, %p965_p1  ;;  %s159_s6 = sshll.u32 %s913_s5, 4  ;;  %s160_s6 = int_to_ptr.vmem [resolvable:$true] %s159_s6 }
   0xe   : > { %s38_s8 = sadd.s32 1, %s896_s14  ;;  %p31_p8 = scmp.ge.s32.totalorder %s29_s7, 2 }
   0xf   : > { %698 = dma.hbm_to_vmem [thread:$0]  (!%p696_p7), %s144_s23, 512, %s146_s26, [#allocation5], %s911_s30, %s911_s30, %s912_s4  }
  0x10   : > { %701 = dma.hbm_to_vmem [thread:$0]  (!%p696_p7), %s158_s29, 512, %s160_s6, [#allocation5], %s911_s30, %s911_s30, %s912_s4  }
  0x11   : > { %p45_p9 = scmp.ne.s32.totalorder %s896_s14, %s892_s13  ;;  %p46_p10 = scmp.eq.s32.totalorder %s908_s17, 0 }
  0x12   : > { %p708_p11 = scmp.lt.s32.totalorder %s908_s17, 2  ;;  %s1126_s7 = smov (%p31_p8, %s29_s7), 0 }
  0x13   : > { %p1005_p12 = por %p46_p10, %p45_p9  ;;  %s173_s10 = sand.u32 1, %s896_s14  }
  0x14   : > { %s33_s11 = ssub.s32 %s904_s16, %s1126_s7  ;;  %s634_s12 = sshll.u32 %s173_s10, 7 }
  0x15   : > { %p36_p13 = scmp.eq.s32.totalorder %s33_s11, 0  ;;  %s675_s18 = sshll.u32 %s904_s16, 7 }
  0x16   : > { %s185_s25 = scalar_lea.hbm %s1112_s0, %s675_s18  ;;  %s177_s26 = scalar_lea.vmem [#allocation2], %s634_s12 }
  0x17   : > { %s1014_s21 = scalar_select %p36_p13, %s896_s14, %s38_s8  }
  0x18   : > { %s188_s27 = sshll.u32 %s177_s26, 4  ;;  %s186_s28 = sshll.u32 %s185_s25, 4  ;;  %s189_s27 = int_to_ptr.vmem [resolvable:$true] %s188_s27  ;;  %s187_s28 = int_to_ptr.hbm [resolvable:$true] %s186_s28 }
  0x19   : > { %p703_p0 = pnand %p708_p11, %p1005_p12  ;;  %s174_s29 = scalar_lea.sflag [#allocation3], %s173_s10 }
  0x1a   : > { %200 = sbr.rel (%p980_p5) target bundleno = 320 (0x140), region = 32  ;;  %s202_s5 = sand.u32 (!%p980_p5), 1, %s892_s13  }
  0x1b   : > { %705 = dma.hbm_to_vmem [thread:$0]  (!%p703_p0), %s187_s28, 2048, %s189_s27, %s174_s29, %s911_s30, %s911_s30, %s912_s4  }
  0x1c   : > { %s638_s6 = sshll.u32 (!%p980_p5), %s202_s5, 7  ;;  %s203_s8 = scalar_lea.sflag (!%p980_p5), [#allocation3], %s202_s5 }
  0x1d   : > { %s1029_s11 = scalar_lea.vmem (!%p980_p5), [#allocation2], %s638_s6 }
  0x1f   : > { %879 = dma.done.wait (%p973_p4), %s203_s8, 2048  }
  0x20   : > { %881 = vsyncadd (%p973_p4), %s203_s8, 4294965248 }
  0x21   : > { %883 = dma.done.wait (%p965_p1), [#allocation5], 1024  }
  0x22   : > { %885 = vsyncadd (%p965_p1), [#allocation5], 4294966272  ;;  %v307_v0 = vld [vmem:[#allocation4 + $0x18] sm:$0xff]  ;;  %v306_v1 = vld [vmem:[#allocation4 + $0x10] sm:$0xff]  ;;  %vm308_vm0 = vcmask 261120   ;;  %s914_s19 = smov 112  }
  0x23   : > { %345 = vmatpush.msra.mxu0 %v307_v0  ;;  %676 = vmatpush.msra.mxu2 %v307_v0  ;;  %v257_v2 = vld [vmem:[%s1029_s11] ss:$2 sm:$0xff]  ;;  %v649_v3 = vld [vmem:[%s1029_s11 + $0x1] ss:$2 sm:$0xff]  ;;  %v377_v10 = vld [vmem:[#allocation6 + $0x18] sm:$0xff]  ;;  %p247_p1 = scmp.lt.s32.totalorder %s900_s15, 1 }
  0x24   : > { %v305_v4 = vld [vmem:[#allocation4 + $0x8] sm:$0xff]  ;;  %v304_v7 = vld [vmem:[#allocation4] sm:$0xff]  ;;  %v288_v8 = vmax.f32 %v257_v2, %v649_v3  ;;  %v642_v11 = vld [vmem:[%s1029_s11 + $0x10] ss:$2 sm:$0xff]  ;;  %680 = vmatpush.msra.mxu3 %v377_v10  ;;  %414 = vmatpush.msra.mxu1 %v377_v10  ;;  %v296_v21 = vadd.f32 %v649_v3, %v257_v2  ;;  %vm499_vm1 = vcmask 130048  }
  0x25   : > { %v645_v5 = vld [vmem:[%s1029_s11 + $0x40] ss:$2 sm:$0xff]  ;;  %v653_v6 = vld [vmem:[%s1029_s11 + $0x41] ss:$2 sm:$0xff]  ;;  %346 = vmatpush.msra.mxu0 %v306_v1  ;;  %677 = vmatpush.msra.mxu2 %v306_v1  ;;  %v376_v12 = vld [vmem:[#allocation6 + $0x10] sm:$0xff]  ;;  %s1128_s15 = smov (!%p247_p1, %s900_s15), 1 }
  0x26   : > { %v292_v9 = vmax.f32 %v645_v5, %v653_v6  ;;  %v650_v13 = vld [vmem:[%s1029_s11 + $0x11] ss:$2 sm:$0xff]  ;;  %v646_v14 = vld [vmem:[%s1029_s11 + $0x50] ss:$2 sm:$0xff]  ;;  %v375_v16 = vld [vmem:[#allocation6 + $0x8] sm:$0xff]  ;;  %681 = vmatpush.msra.mxu3 %v376_v12  ;;  %415 = vmatpush.msra.mxu1 %v376_v12  ;;  %v300_v20 = vadd.f32 %v653_v6, %v645_v5  ;;  %s684_s20 = smul.u32 192, %s1128_s15 }
  0x27   : > { %347 = vmatpush.msra.mxu0 %v305_v4  ;;  %678 = vmatpush.msra.mxu2 %v305_v4  ;;  %v654_v15 = vld [vmem:[%s1029_s11 + $0x51] ss:$2 sm:$0xff]  ;;  %v289_v17 = vmax.f32 %v642_v11, %v650_v13  ;;  %v374_v19 = vld [vmem:[#allocation6] sm:$0xff]  ;;  %v297_v29 = vadd.f32 %v650_v13, %v642_v11  ;;  %v644_v30 = vld [vmem:[%s1029_s11 + $0x30] ss:$2 sm:$0xff] }
  0x28   : > { %v293_v18 = vmax.f32 %v646_v14, %v654_v15  ;;  %682 = vmatpush.msra.mxu3 %v375_v16  ;;  %416 = vmatpush.msra.mxu1 %v375_v16  ;;  %v643_v22 = vld [vmem:[%s1029_s11 + $0x20] ss:$2 sm:$0xff]  ;;  %v651_v23 = vld [vmem:[%s1029_s11 + $0x21] ss:$2 sm:$0xff]  ;;  %v301_v28 = vadd.f32 %v654_v15, %v646_v14  ;;  %v652_v31 = vld [vmem:[%s1029_s11 + $0x31] ss:$2 sm:$0xff]  ;;  %s1076_s4 = scalar_lea.vmem %s1115_s3, %s684_s20 }
  0x29   : > { %348 = vmatpush.msra.mxu0 %v304_v7  ;;  %679 = vmatpush.msra.mxu2 %v304_v7  ;;  %v647_v24 = vld [vmem:[%s1029_s11 + $0x60] ss:$2 sm:$0xff]  ;;  %v655_v25 = vld [vmem:[%s1029_s11 + $0x61] ss:$2 sm:$0xff]  ;;  %v290_v26 = vmax.f32 %v643_v22, %v651_v23  ;;  %v648_v32 = vld [vmem:[%s1029_s11 + $0x70] ss:$2 sm:$0xff]  ;;  %v291_v34 = vmax.f32 %v644_v30, %v652_v31  ;;  %v298_v36 = vadd.f32 %v651_v23, %v643_v22 }
  0x2a   : > { %657 = vmatmul.msk.f32.vlgmr.msra.gmra.mxu0 %vm308_vm0, %v288_v8  ;;  %661 = vmatmul.msk.f32.vlgmr.msra.gmra.mxu2 %vm308_vm0, %v292_v9  ;;  %v294_v27 = vmax.f32 %v647_v24, %v655_v25  ;;  %v656_v33 = vld [vmem:[%s1029_s11 + $0x71] ss:$2 sm:$0xff]  ;;  %v302_v37 = vadd.f32 %v655_v25, %v647_v24  ;;  %v299_v38 = vadd.f32 %v652_v31, %v644_v30 }
  0x2b   : > { %683 = vmatpush.msra.mxu3 %v374_v19  ;;  %417 = vmatpush.msra.mxu1 %v374_v19  ;;  %v295_v35 = vmax.f32 %v648_v32, %v656_v33  ;;  %v303_v39 = vadd.f32 %v656_v33, %v648_v32 }
  0x2c   : > { %669 = vmatmul.msk.f32.vlgmr.msra.gmra.mxu3 %vm308_vm0, %v300_v20  ;;  %665 = vmatmul.msk.f32.vlgmr.msra.gmra.mxu1 %vm308_vm0, %v296_v21 }
  0x32   : > { %658 = vmatmul.msk.f32.gmra.mxu0 %vm308_vm0, %v289_v17  ;;  %662 = vmatmul.msk.f32.gmra.mxu2 %vm308_vm0, %v293_v18 }
  0x34   : > { %670 = vmatmul.msk.f32.gmra.mxu3 %vm308_vm0, %v301_v28  ;;  %666 = vmatmul.msk.f32.gmra.mxu1 %vm308_vm0, %v297_v29 }
  0x3a   : > { %659 = vmatmul.msk.f32.gmra.mxu0 %vm308_vm0, %v290_v26  ;;  %663 = vmatmul.msk.f32.gmra.mxu2 %vm308_vm0, %v294_v27 }
  0x3c   : > { %667 = vmatmul.msk.f32.gmra.mxu1 %vm308_vm0, %v298_v36  ;;  %671 = vmatmul.msk.f32.gmra.mxu3 %vm308_vm0, %v302_v37 }
  0x42   : > { %660 = vmatmul.msk.f32.gmra.mxu0 %vm308_vm0, %v291_v34  ;;  %664 = vmatmul.msk.f32.gmra.mxu2 %vm308_vm0, %v295_v35 }
  0x44   : > { %668 = vmatmul.msk.f32.gmra.mxu1 %vm308_vm0, %v299_v38  ;;  %672 = vmatmul.msk.f32.gmra.mxu3 %vm308_vm0, %v303_v39 }
  0xa7   : > { %v350_v40 = vpop.f32.mrf.mxu0 }
  0xa8   : > { %451 = vrot.lane.b32.xlu0 %v350_v40, %s914_s19 }
  0xa9   : > { %v419_v56 = vpop.f32.mrf.mxu1 }
  0xaa   : > { %v483_v59 = vmul.f32 0.25, %v419_v56 }
  0xad   : > { %v362_v41 = vpop.f32.mrf.mxu2 }
  0xae   : > { %459 = vrot.lane.b32.xlu2 %v362_v41, %s914_s19 }
  0xaf   : > { %v353_v42 = vpop.f32.mrf.mxu0  ;;  %v431_v48 = vpop.f32.mrf.mxu3 }
  0xb0   : > { %453 = vrot.lane.b32.xlu0 %v353_v42, %s914_s19  ;;  %v487_v49 = vmul.f32 0.25, %v431_v48 }
  0xb1   : > { %v422_v61 = vpop.f32.mrf.mxu1 }
  0xb2   : > { %v484_v0 = vmul.f32 0.25, %v422_v61 }
  0xb5   : > { %v365_v43 = vpop.f32.mrf.mxu2 }
  0xb6   : > { %461 = vrot.lane.b32.xlu2 %v365_v43, %s914_s19 }
  0xb7   : > { %v356_v44 = vpop.f32.mrf.mxu0  ;;  %v434_v53 = vpop.f32.mrf.mxu3 }
  0xb8   : > { %455 = vrot.lane.b32.xlu1 %v356_v44, %s914_s19  ;;  %v488_v54 = vmul.f32 0.25, %v434_v53 }
  0xb9   : > { %v425_v3 = vpop.f32.mrf.mxu1 }
  0xba   : > { %v485_v5 = vmul.f32 0.25, %v425_v3 }
  0xbd   : > { %v368_v45 = vpop.f32.mrf.mxu2 }
  0xbe   : > { %463 = vrot.lane.b32.xlu0 %v368_v45, %s914_s19 }
  0xbf   : > { %v359_v46 = vpop.f32.mrf.mxu0  ;;  %v437_v8 = vpop.f32.mrf.mxu3 }
  0xc0   : > { %457 = vrot.lane.b32.xlu1 %v359_v46, %s914_s19  ;;  %v489_v11 = vmul.f32 0.25, %v437_v8 }
  0xc1   : > { %v428_v10 = vpop.f32.mrf.mxu1 }
  0xc2   : > { %v486_v14 = vmul.f32 0.25, %v428_v10 }
  0xc5   : > { %v371_v47 = vpop.f32.mrf.mxu2 }
  0xc7   : > { %v440_v19 = vpop.f32.mrf.mxu3 }
  0xc8   : > { %465 = vrot.lane.b32.xlu1 %v371_v47, %s914_s19  ;;  %v490_v20 = vmul.f32 0.25, %v440_v19 }
 0x108   : > { %v460_v50 = vpop.permute.xlu2 %459 }
 0x109   : > { %v479_v51 = vmax.f32 %v362_v41, %v460_v50 }
 0x10b   : > { %v495_v52 = vadd.f32 %v487_v49, %v479_v51 }
 0x10d   : > { %504 = vst.msk [vmem:[%s1076_s4 + $0x20] sm:$0xff] %vm499_vm1, %v495_v52 }
 0x110   : > { %v462_v55 = vpop.permute.xlu2 %461 }
 0x111   : > { %v480_v57 = vmax.f32 %v365_v43, %v462_v55 }
 0x113   : > { %v496_v58 = vadd.f32 %v488_v54, %v480_v57 }
 0x115   : > { %505 = vst.msk [vmem:[%s1076_s4 + $0x28] sm:$0xff] %vm499_vm1, %v496_v58 }
 0x11a   : > { %v452_v60 = vpop.permute.xlu0 %451 }
 0x11b   : > { %v475_v62 = vmax.f32 %v350_v40, %v452_v60 }
 0x11d   : > { %v491_v63 = vadd.f32 %v483_v59, %v475_v62 }
 0x11f   : > { %500 = vst.msk [vmem:[%s1076_s4] sm:$0xff] %vm499_vm1, %v491_v63 }
 0x122   : > { %v454_v1 = vpop.permute.xlu0 %453 }
 0x123   : > { %v476_v2 = vmax.f32 %v353_v42, %v454_v1 }
 0x125   : > { %v492_v4 = vadd.f32 %v484_v0, %v476_v2 }
 0x127   : > { %501 = vst.msk [vmem:[%s1076_s4 + $0x8] sm:$0xff] %vm499_vm1, %v492_v4 }
 0x12a   : > { %v456_v6 = vpop.permute.xlu1 %455 }
 0x12b   : > { %v477_v7 = vmax.f32 %v356_v44, %v456_v6 }
 0x12d   : > { %v493_v9 = vadd.f32 %v485_v5, %v477_v7 }
 0x12f   : > { %502 = vst.msk [vmem:[%s1076_s4 + $0x10] sm:$0xff] %vm499_vm1, %v493_v9 }
 0x130   : > { %v464_v12 = vpop.permute.xlu0 %463 }
 0x131   : > { %v481_v13 = vmax.f32 %v368_v45, %v464_v12 }
 0x132   : > { %v458_v15 = vpop.permute.xlu1 %457 }
 0x133   : > { %v497_v16 = vadd.f32 %v489_v11, %v481_v13  ;;  %v478_v17 = vmax.f32 %v359_v46, %v458_v15 }
 0x135   : > { %506 = vst.msk [vmem:[%s1076_s4 + $0x30] sm:$0xff] %vm499_vm1, %v497_v16  ;;  %v494_v18 = vadd.f32 %v486_v14, %v478_v17 }
 0x137   : > { %503 = vst.msk [vmem:[%s1076_s4 + $0x18] sm:$0xff] %vm499_vm1, %v494_v18 }
 0x13a   : > { %v466_v21 = vpop.permute.xlu1 %465 }
 0x13b   : > { %v482_v22 = vmax.f32 %v371_v47, %v466_v21 }
 0x13d   : > { %v498_v23 = vadd.f32 %v490_v20, %v482_v22 }
 0x13f   : > { %507 = vst.msk [vmem:[%s1076_s4 + $0x38] sm:$0xff] %vm499_vm1, %v498_v23 }
 0x140 PF: > { %s17_s17 = sadd.s32 1, %s908_s17   ;;  %s1120_s12 = smov %s892_s13 }
 0x141   : > { %p14_p2 = scmp.ge.s32.totalorder %s17_s17, 4   ;;  %s1121_s13 = smov %s896_s14 }
 0x142   : > { %s1122_s14 = smov %s1014_s21  ;;  %s1123_s15 = smov %s904_s16 }
 0x143   : > { %s1124_s16 = smov %s1126_s7  ;;  %16 = sbr.rel (!%p14_p2) target bundleno = 5 (0x5), region = 95 }
 0x148   :  { %540 = vsyncpa [#allocation3], 1 }
 0x149   :  { %542 = vsyncpa [#allocation3 + $0x1], 1 }
 0x14a   :  { %543 = vsyncpa [#allocation5], 1 }

</bundles_post_ra>
